<compile_context>
chip_gen: v5e
topology: v5e:2x2
jax: 0.10.0
libtpu: 0.0.40
codegen_flags: <defaults>
</compile_context>

<pallas_src>
import jax
import jax.numpy as jnp
from jax.experimental import pallas as pl
from jax.experimental.pallas import tpu as pltpu


def _round_up(n, m):
    return ((n + m - 1) // m) * m


def _diffusion_mlp_kernel(
    x_ref,                # (TB, input_dim)  bf16   (t already folded in as last column)
    w1_ref, b1_ref,       # (input_dim, Hp) bf16 / (1, Hp) f32
    w2_ref, b2_ref,       # (Hp, Hp)        bf16 / (1, Hp) f32
    w3_ref, b3_ref,       # (Hp, Hp)        bf16 / (1, Hp) f32
    w4_ref, b4_ref,       # (Hp, O)         bf16 / (1, O)  f32
    out_ref,              # (TB, O)          f32
):
    # Layer 1 (cat([x, t]) already done in the wrapper -> one MXU matmul, K=16).
    h = jnp.dot(x_ref[...], w1_ref[...], preferred_element_type=jnp.float32)
    h = jnp.maximum(h + b1_ref[...], 0.0).astype(jnp.bfloat16)

    # Layer 2
    h = jnp.dot(h, w2_ref[...], preferred_element_type=jnp.float32)
    h = jnp.maximum(h + b2_ref[...], 0.0).astype(jnp.bfloat16)

    # Layer 3
    h = jnp.dot(h, w3_ref[...], preferred_element_type=jnp.float32)
    h = jnp.maximum(h + b3_ref[...], 0.0).astype(jnp.bfloat16)

    # Layer 4 (no activation); store f32, only the real output columns.
    y = jnp.dot(h, w4_ref[...], preferred_element_type=jnp.float32) + b4_ref[...]
    out_ref[...] = y.astype(out_ref.dtype)


def _choose_batch_tile(B, max_tile, target_steps):
    """Multiple-of-16 batch tile giving >= target_steps grid steps when B allows,
    capped at max_tile and never larger than the 8-aligned batch itself."""
    tb = _round_up(max(pl.cdiv(B, target_steps), 1), 16)
    tb = min(max(tb, 16), max_tile, _round_up(B, 8))
    return tb


def diffusion_net_forward(x, t, kernel_params, *, max_batch_tile=4096, target_steps=4):
    """x: (B, input_dim-1) f32, t: (B,) f32 -> (B, output_dim) f32."""
    B, F = x.shape
    input_dim = F + 1

    # Fold t into x (exactly torch.cat([x, t.unsqueeze(1)], dim=1)), cast to bf16.
    h_in = jnp.concatenate([x, t.reshape(B, 1)], axis=1).astype(jnp.bfloat16)

    (w1, b1, w2, b2, w3, b3, w4, b4) = kernel_params
    H_pad = w2.shape[0]
    O = w4.shape[1]                     # real output dim (not lane padded)

    TB = _choose_batch_tile(B, max_batch_tile, target_steps)
    grid = (pl.cdiv(B, TB),)            # ragged last block handled by Pallas

    batch_map = lambda i: (i, 0)        # activations: tile i of the batch
    resident = lambda i: (0, 0)         # weights/biases: same block -> VMEM-resident

    in_specs = [pl.BlockSpec((TB, input_dim), batch_map)]
    in_specs += [pl.BlockSpec(p.shape, resident) for p in kernel_params]
    out_specs = pl.BlockSpec((TB, O), batch_map)

    flops_per_row = 2 * (input_dim * H_pad + 2 * H_pad * H_pad + H_pad * O)
    param_bytes = sum(int(p.size) * p.dtype.itemsize for p in kernel_params)
    cost = pl.CostEstimate(
        flops=int(B * flops_per_row),
        transcendentals=0,
        bytes_accessed=int(B * (input_dim * 2 + O * 4) + param_bytes),
    )

    out = pl.pallas_call(
        _diffusion_mlp_kernel,
        out_shape=jax.ShapeDtypeStruct((B, O), jnp.float32),
        grid=grid,
        in_specs=in_specs,
        out_specs=out_specs,
        compiler_params=pltpu.CompilerParams(
            dimension_semantics=("parallel",),
            vmem_limit_bytes=32 * 1024 * 1024,
        ),
        cost_estimate=cost,
    )(h_in, *kernel_params)
    return out


def init_logical_params(key, input_dim, hidden_dim, output_dim):
    """Torch-like Linear init; weights stored as (in, out) so y = x @ W + b."""
    ks = jax.random.split(key, 8)

    def lin(kw, kb, fan_in, fan_out):
        bound = 1.0 / jnp.sqrt(fan_in)
        w = jax.random.uniform(kw, (fan_in, fan_out), jnp.float32, -bound, bound)
        b = jax.random.uniform(kb, (1, fan_out), jnp.float32, -bound, bound)
        return w, b

    w1, b1 = lin(ks[0], ks[1], input_dim, hidden_dim)
    w2, b2 = lin(ks[2], ks[3], hidden_dim, hidden_dim)
    w3, b3 = lin(ks[4], ks[5], hidden_dim, hidden_dim)
    w4, b4 = lin(ks[6], ks[7], hidden_dim, output_dim)
    return (w1, b1, w2, b2, w3, b3, w4, b4)


def prepare_kernel_params(logical_params, input_dim, hidden_dim, output_dim):
    """Zero-pad the hidden dim to 128 lanes, cast weights to bf16.

    Zero padding is exact: padded hidden units are relu(0 + 0) = 0 and feed
    zero-weight rows of the next layer.  The output dim is NOT padded: the
    kernel writes only the real output columns (no write amplification).
    """
    (w1, b1, w2, b2, w3, b3, w4, b4) = logical_params
    H_pad = _round_up(hidden_dim, 128)

    def pad2(a, rows, cols):
        return jnp.pad(a, ((0, rows - a.shape[0]), (0, cols - a.shape[1])))

    return (
        pad2(w1, input_dim, H_pad).astype(jnp.bfloat16),
        pad2(b1, 1, H_pad).astype(jnp.float32),
        pad2(w2, H_pad, H_pad).astype(jnp.bfloat16),
        pad2(b2, 1, H_pad).astype(jnp.float32),
        pad2(w3, H_pad, H_pad).astype(jnp.bfloat16),
        pad2(b3, 1, H_pad).astype(jnp.float32),
        pad2(w4, H_pad, output_dim).astype(jnp.bfloat16),
        b4.astype(jnp.float32),
    )


def reference_forward(x, t, logical_params):
    """Plain-JAX reference with the same numerics (bf16 operands, f32 accum)."""
    (w1, b1, w2, b2, w3, b3, w4, b4) = logical_params
    h = jnp.concatenate([x, t[:, None]], axis=1).astype(jnp.bfloat16)

    def layer(h, w, b, act):
        y = jnp.dot(h, w.astype(jnp.bfloat16),
                    preferred_element_type=jnp.float32) + b
        if act:
            y = jnp.maximum(y, 0.0).astype(jnp.bfloat16)
        return y

    h = layer(h, w1, b1, True)
    h = layer(h, w2, b2, True)
    h = layer(h, w3, b3, True)
    return layer(h, w4, b4, False)


if __name__ == "__main__":
    # Small shapes consistent with the module: the first Linear expects
    # input_dim = (x features) + 1 (the appended t scalar).
    input_dim = 16
    hidden_dim = 32
    output_dim = 10

    key = jax.random.PRNGKey(0)
    kx, kt, kp = jax.random.split(key, 3)

    logical_params = init_logical_params(kp, input_dim, hidden_dim, output_dim)
    kernel_params = prepare_kernel_params(
        logical_params, input_dim, hidden_dim, output_dim)

    # Case 1: tiny batch -> single grid step, block == array extent.
    B1 = 8
    x1 = jax.random.normal(kx, (B1, input_dim - 1), jnp.float32)
    t1 = jax.random.uniform(kt, (B1,), jnp.float32)
    out1 = jax.block_until_ready(diffusion_net_forward(x1, t1, kernel_params))
    ref1 = reference_forward(x1, t1, logical_params)
    assert out1.shape == (B1, output_dim)
    assert out1.dtype == jnp.float32
    assert jnp.allclose(out1, ref1, atol=1e-2, rtol=1e-2)

    # Case 2: batch not divisible by the tile -> multi-step "parallel" grid
    # with a ragged last block (no wrapper-side padding or output slicing).
    B2 = 29
    kx2, kt2 = jax.random.split(jax.random.PRNGKey(1), 2)
    x2 = jax.random.normal(kx2, (B2, input_dim - 1), jnp.float32)
    t2 = jax.random.uniform(kt2, (B2,), jnp.float32)
    out2 = jax.block_until_ready(diffusion_net_forward(x2, t2, kernel_params))
    ref2 = reference_forward(x2, t2, logical_params)
    assert out2.shape == (B2, output_dim)
    assert jnp.allclose(out2, ref2, atol=1e-2, rtol=1e-2)

    print("KERNEL_OK")
</pallas_src>

<mosaic_0001>
module attributes {stable_mosaic.version = 11 : i64} {
  func.func @_diffusion_mlp_kernel(%arg0: i32, %arg1: memref<8x16xbf16, #tpu.memory_space<vmem>>, %arg2: memref<16x128xbf16, #tpu.memory_space<vmem>>, %arg3: memref<1x128xf32, #tpu.memory_space<vmem>>, %arg4: memref<128x128xbf16, #tpu.memory_space<vmem>>, %arg5: memref<1x128xf32, #tpu.memory_space<vmem>>, %arg6: memref<128x128xbf16, #tpu.memory_space<vmem>>, %arg7: memref<1x128xf32, #tpu.memory_space<vmem>>, %arg8: memref<128x10xbf16, #tpu.memory_space<vmem>>, %arg9: memref<1x10xf32, #tpu.memory_space<vmem>>, %arg10: memref<8x10xf32, #tpu.memory_space<vmem>>) attributes {dimension_semantics = [#tpu.dimension_semantics<parallel>], iteration_bounds = array<i64: 1>, scalar_prefetch = 0 : i64, scratch_operands = 0 : i64, tpu.core_type = #tpu.core_type<tc>, window_params = [{transform_indices = @transform_0, window_bounds = array<i64: 8, 16>}, {pipeline_mode = #tpu.pipeline_mode<synchronous>, transform_indices = @transform_1, window_bounds = array<i64: 16, 128>}, {pipeline_mode = #tpu.pipeline_mode<synchronous>, transform_indices = @transform_2, window_bounds = array<i64: 1, 128>}, {pipeline_mode = #tpu.pipeline_mode<synchronous>, transform_indices = @transform_3, window_bounds = array<i64: 128, 128>}, {pipeline_mode = #tpu.pipeline_mode<synchronous>, transform_indices = @transform_4, window_bounds = array<i64: 1, 128>}, {pipeline_mode = #tpu.pipeline_mode<synchronous>, transform_indices = @transform_5, window_bounds = array<i64: 128, 128>}, {pipeline_mode = #tpu.pipeline_mode<synchronous>, transform_indices = @transform_6, window_bounds = array<i64: 1, 128>}, {pipeline_mode = #tpu.pipeline_mode<synchronous>, transform_indices = @transform_7, window_bounds = array<i64: 128, 10>}, {pipeline_mode = #tpu.pipeline_mode<synchronous>, transform_indices = @transform_8, window_bounds = array<i64: 1, 10>}, {transform_indices = @transform_9, window_bounds = array<i64: 8, 10>}]} {
    %c0 = arith.constant 0 : index
    %c0_0 = arith.constant 0 : index
    %0 = vector.load %arg1[%c0, %c0_0] : memref<8x16xbf16, #tpu.memory_space<vmem>>, vector<8x16xbf16>
    %c0_1 = arith.constant 0 : index
    %c0_2 = arith.constant 0 : index
    %1 = vector.load %arg2[%c0_1, %c0_2] : memref<16x128xbf16, #tpu.memory_space<vmem>>, vector<16x128xbf16>
    %cst = arith.constant dense<0.000000e+00> : vector<8x128xf32>
    %2 = tpu.matmul %0, %1, %cst {dimension_numbers = #tpu.dot_dimension_numbers<[1], [0], [0], [1], [0, 0, 1, 1], [], []>} : vector<8x16xbf16>, vector<16x128xbf16>, vector<8x128xf32> -> vector<8x128xf32>
    %c0_3 = arith.constant 0 : index
    %c0_4 = arith.constant 0 : index
    %3 = vector.load %arg3[%c0_3, %c0_4] : memref<1x128xf32, #tpu.memory_space<vmem>>, vector<1x128xf32>
    %4 = vector.broadcast %3 : vector<1x128xf32> to vector<8x128xf32>
    %5 = arith.addf %2, %4 : vector<8x128xf32>
    %cst_5 = arith.constant 0.000000e+00 : f32
    %6 = vector.broadcast %cst_5 : f32 to vector<8x128xf32>
    %7 = arith.maximumf %5, %6 : vector<8x128xf32>
    %8 = arith.truncf %7 : vector<8x128xf32> to vector<8x128xbf16>
    %c0_6 = arith.constant 0 : index
    %c0_7 = arith.constant 0 : index
    %9 = vector.load %arg4[%c0_6, %c0_7] : memref<128x128xbf16, #tpu.memory_space<vmem>>, vector<128x128xbf16>
    %cst_8 = arith.constant dense<0.000000e+00> : vector<8x128xf32>
    %10 = tpu.matmul %8, %9, %cst_8 {dimension_numbers = #tpu.dot_dimension_numbers<[1], [0], [0], [1], [0, 0, 1, 1], [], []>} : vector<8x128xbf16>, vector<128x128xbf16>, vector<8x128xf32> -> vector<8x128xf32>
    %c0_9 = arith.constant 0 : index
    %c0_10 = arith.constant 0 : index
    %11 = vector.load %arg5[%c0_9, %c0_10] : memref<1x128xf32, #tpu.memory_space<vmem>>, vector<1x128xf32>
    %12 = vector.broadcast %11 : vector<1x128xf32> to vector<8x128xf32>
    %13 = arith.addf %10, %12 : vector<8x128xf32>
    %cst_11 = arith.constant 0.000000e+00 : f32
    %14 = vector.broadcast %cst_11 : f32 to vector<8x128xf32>
    %15 = arith.maximumf %13, %14 : vector<8x128xf32>
    %16 = arith.truncf %15 : vector<8x128xf32> to vector<8x128xbf16>
    %c0_12 = arith.constant 0 : index
    %c0_13 = arith.constant 0 : index
    %17 = vector.load %arg6[%c0_12, %c0_13] : memref<128x128xbf16, #tpu.memory_space<vmem>>, vector<128x128xbf16>
    %cst_14 = arith.constant dense<0.000000e+00> : vector<8x128xf32>
    %18 = tpu.matmul %16, %17, %cst_14 {dimension_numbers = #tpu.dot_dimension_numbers<[1], [0], [0], [1], [0, 0, 1, 1], [], []>} : vector<8x128xbf16>, vector<128x128xbf16>, vector<8x128xf32> -> vector<8x128xf32>
    %c0_15 = arith.constant 0 : index
    %c0_16 = arith.constant 0 : index
    %19 = vector.load %arg7[%c0_15, %c0_16] : memref<1x128xf32, #tpu.memory_space<vmem>>, vector<1x128xf32>
    %20 = vector.broadcast %19 : vector<1x128xf32> to vector<8x128xf32>
    %21 = arith.addf %18, %20 : vector<8x128xf32>
    %cst_17 = arith.constant 0.000000e+00 : f32
    %22 = vector.broadcast %cst_17 : f32 to vector<8x128xf32>
    %23 = arith.maximumf %21, %22 : vector<8x128xf32>
    %24 = arith.truncf %23 : vector<8x128xf32> to vector<8x128xbf16>
    %c0_18 = arith.constant 0 : index
    %c0_19 = arith.constant 0 : index
    %25 = vector.load %arg8[%c0_18, %c0_19] : memref<128x10xbf16, #tpu.memory_space<vmem>>, vector<128x10xbf16>
    %cst_20 = arith.constant dense<0.000000e+00> : vector<8x10xf32>
    %26 = tpu.matmul %24, %25, %cst_20 {dimension_numbers = #tpu.dot_dimension_numbers<[1], [0], [0], [1], [0, 0, 1, 1], [], []>} : vector<8x128xbf16>, vector<128x10xbf16>, vector<8x10xf32> -> vector<8x10xf32>
    %c0_21 = arith.constant 0 : index
    %c0_22 = arith.constant 0 : index
    %27 = vector.load %arg9[%c0_21, %c0_22] : memref<1x10xf32, #tpu.memory_space<vmem>>, vector<1x10xf32>
    %28 = vector.broadcast %27 : vector<1x10xf32> to vector<8x10xf32>
    %29 = arith.addf %26, %28 : vector<8x10xf32>
    %c0_23 = arith.constant 0 : index
    %c0_24 = arith.constant 0 : index
    %30 = vector.load %arg10[%c0_23, %c0_24] : memref<8x10xf32, #tpu.memory_space<vmem>>, vector<8x10xf32>
    tpu.vector_store %arg10[%c0_23, %c0_24], %29 {strides = array<i32>} : memref<8x10xf32, #tpu.memory_space<vmem>>, vector<8x10xf32>,
    return
  }
  func.func @transform_0(%arg0: i32) -> (i32, i32) {
    %c0_i32 = arith.constant 0 : i32
    %c0_i32_0 = arith.constant 0 : i32
    return %arg0, %c0_i32 : i32, i32
  }
  func.func @transform_1(%arg0: i32) -> (i32, i32) {
    %c0_i32 = arith.constant 0 : i32
    %c0_i32_0 = arith.constant 0 : i32
    %c0_i32_1 = arith.constant 0 : i32
    return %c0_i32, %c0_i32_0 : i32, i32
  }
  func.func @transform_2(%arg0: i32) -> (i32, i32) {
    %c0_i32 = arith.constant 0 : i32
    %c0_i32_0 = arith.constant 0 : i32
    %c0_i32_1 = arith.constant 0 : i32
    return %c0_i32, %c0_i32_0 : i32, i32
  }
  func.func @transform_3(%arg0: i32) -> (i32, i32) {
    %c0_i32 = arith.constant 0 : i32
    %c0_i32_0 = arith.constant 0 : i32
    %c0_i32_1 = arith.constant 0 : i32
    return %c0_i32, %c0_i32_0 : i32, i32
  }
  func.func @transform_4(%arg0: i32) -> (i32, i32) {
    %c0_i32 = arith.constant 0 : i32
    %c0_i32_0 = arith.constant 0 : i32
    %c0_i32_1 = arith.constant 0 : i32
    return %c0_i32, %c0_i32_0 : i32, i32
  }
  func.func @transform_5(%arg0: i32) -> (i32, i32) {
    %c0_i32 = arith.constant 0 : i32
    %c0_i32_0 = arith.constant 0 : i32
    %c0_i32_1 = arith.constant 0 : i32
    return %c0_i32, %c0_i32_0 : i32, i32
  }
  func.func @transform_6(%arg0: i32) -> (i32, i32) {
    %c0_i32 = arith.constant 0 : i32
    %c0_i32_0 = arith.constant 0 : i32
    %c0_i32_1 = arith.constant 0 : i32
    return %c0_i32, %c0_i32_0 : i32, i32
  }
  func.func @transform_7(%arg0: i32) -> (i32, i32) {
    %c0_i32 = arith.constant 0 : i32
    %c0_i32_0 = arith.constant 0 : i32
    %c0_i32_1 = arith.constant 0 : i32
    return %c0_i32, %c0_i32_0 : i32, i32
  }
  func.func @transform_8(%arg0: i32) -> (i32, i32) {
    %c0_i32 = arith.constant 0 : i32
    %c0_i32_0 = arith.constant 0 : i32
    %c0_i32_1 = arith.constant 0 : i32
    return %c0_i32, %c0_i32_0 : i32, i32
  }
  func.func @transform_9(%arg0: i32) -> (i32, i32) {
    %c0_i32 = arith.constant 0 : i32
    %c0_i32_0 = arith.constant 0 : i32
    return %arg0, %c0_i32 : i32, i32
  }
}

</mosaic_0001>

<bundles_post_ra>
// kernel: tpu_custom_call.1
= control target key start
LH: loop header
LB: loop body
LE: loop exit
PB: predicated region body
PF: predicated region fallthrough
CT: control target
= control target key end

     0   :  { %14 = vsyncpa [#allocation3], 0  ;;  %s703_s0 = inlined_call_operand.hbm [shape: bf16[8,16], index: 0, kind: input, shape index: {}]   ;;  %s704_s1 = inlined_call_operand.vmem [shape: bf16[16,128], index: 1, kind: input, shape index: {}]   ;;  %s705_s2 = inlined_call_operand.vmem [shape: f32[1,128], index: 2, kind: input, shape index: {}]   ;;  %s706_s3 = inlined_call_operand.vmem [shape: bf16[128,128], index: 3, kind: input, shape index: {}]   ;;  %s707_s4 = inlined_call_operand.vmem [shape: f32[1,128], index: 4, kind: input, shape index: {}]   ;;  %s708_s5 = inlined_call_operand.hbm [shape: bf16[128,128], index: 5, kind: input, shape index: {}]   ;;  %s709_s6 = inlined_call_operand.vmem [shape: f32[1,128], index: 6, kind: input, shape index: {}]   ;;  %s710_s7 = inlined_call_operand.vmem [shape: bf16[128,10], index: 7, kind: input, shape index: {}]   ;;  %s711_s8 = inlined_call_operand.vmem [shape: f32[1,10], index: 8, kind: input, shape index: {}]   ;;  %s712_s9 = inlined_call_operand.hbm [shape: f32[8,10], index: 9, kind: output, shape index: {}]  }
   0x1   :  { %15 = vsyncpa [#allocation6], 0 }
   0x2   :  { %16 = vsyncpa [#allocation4], 0  ;;  %s22_s11 = sshll.u32 %s703_s0, 4  ;;  %s576_s12 = smov [#allocation2]   ;;  %s23_s11 = int_to_ptr.hbm [resolvable:$true] %s22_s11 }
   0x3   :  { %s24_s13 = sshll.u32 %s576_s12, 4  ;;  %s40_s16 = sshll.u32 %s708_s5, 4  ;;  %s25_s13 = int_to_ptr.vmem [resolvable:$true] %s24_s13  ;;  %s41_s16 = int_to_ptr.hbm [resolvable:$true] %s40_s16 }
   0x4   :  { %27 = dma.hbm_to_vmem [thread:$0]  %s23_s11, 64, %s25_s13, [#allocation3]  }
   0x5   :  { %s577_s17 = smov [#allocation5]   ;;  %s578_s19 = smov 64  }
   0x6   :  { %s42_s18 = sshll.u32 %s577_s17, 4  ;;  %s579_s20 = smov 4   ;;  %s43_s18 = int_to_ptr.vmem [resolvable:$true] %s42_s18 }
   0x7   :  { %48 = dma.hbm_to_vmem [thread:$0]  %s41_s16, 1024, %s43_s18, [#allocation6], %s578_s19, %s578_s19, %s579_s20  }
   0x8   :  { %570 = dma.done.wait [#allocation3], 64  }
   0x9   :  { %571 = vsyncadd [#allocation3], 4294967232 }
   0xa   :  { %572 = dma.done.wait [#allocation6], 1024  }
   0xb   :  { %573 = vsyncadd [#allocation6], 4294966272  ;;  %v464_v0 = vld [vmem:[%s704_s1] sm:$0xff]  ;;  %v472_v1 = vld [vmem:[%s706_s3 + $0x38] sm:$0xff]  ;;  %vm77_vm0 = vcmask 130048   ;;  %s580_s12 = smov [#allocation7]  }
   0xc   :  { %88 = vmatpush.bf16.msra.mxu0 %v464_v0  ;;  %v64_v2 = vld [vmem:[#allocation2] sm:$0xf]  ;;  %164 = vmatpush.bf16.msra.mxu1 %v472_v1  ;;  %v471_v3 = vld [vmem:[%s706_s3 + $0x30] sm:$0xff]  ;;  %v470_v4 = vld [vmem:[%s706_s3 + $0x28] sm:$0xff]  ;;  %s350_s13 = sshll.u32 %s580_s12, 4  ;;  %vm343_vm1 = vcmask 80896   ;;  %s351_s13 = int_to_ptr.vmem [resolvable:$true] %s350_s13 }
   0xd   :  { %v469_v5 = vld [vmem:[%s706_s3 + $0x20] sm:$0xff]  ;;  %v468_v6 = vld [vmem:[%s706_s3 + $0x18] sm:$0xff]  ;;  %v467_v7 = vld [vmem:[%s706_s3 + $0x10] sm:$0xff] }
   0xe   :  { %v466_v8 = vld [vmem:[%s706_s3 + $0x8] sm:$0xff]  ;;  %v465_v9 = vld [vmem:[%s706_s3] sm:$0xff]  ;;  %v479_v11 = vld [vmem:[#allocation5 + $0x30] sm:$0xff] }
   0xf   :  { %367 = vmatmul.msk.bf16.vlgmr.msra.gmra.mxu0 %vm77_vm0, %v64_v2  ;;  %v480_v10 = vld [vmem:[#allocation5 + $0x38] sm:$0xff]  ;;  %v478_v12 = vld [vmem:[#allocation5 + $0x28] sm:$0xff]  ;;  %v477_v13 = vld [vmem:[#allocation5 + $0x20] sm:$0xff] }
  0x10   :  { %165 = vmatpush.bf16.msra.mxu1 %v471_v3  ;;  %247 = vmatpush.bf16.msra.mxu2 %v480_v10  ;;  %v476_v14 = vld [vmem:[#allocation5 + $0x18] sm:$0xff]  ;;  %v475_v15 = vld [vmem:[#allocation5 + $0x10] sm:$0xff]  ;;  %v474_v22 = vld [vmem:[#allocation5 + $0x8] sm:$0xff] }
  0x11   :  { %v494_v16 = vld [vmem:[%s705_s2] ss:$0 sm:$0xff]  ;;  %v473_v23 = vld [vmem:[#allocation5] sm:$0xff]  ;;  %v488_v24 = vld [vmem:[%s710_s7 + $0x38] sm:$0xff] }
  0x12   :  { %330 = vmatpush.bf16.msra.mxu3 %v488_v24  ;;  %v487_v25 = vld [vmem:[%s710_s7 + $0x30] sm:$0xff]  ;;  %v486_v26 = vld [vmem:[%s710_s7 + $0x28] sm:$0xff]  ;;  %v485_v27 = vld [vmem:[%s710_s7 + $0x20] sm:$0xff] }
  0x13   :  { %v484_v28 = vld [vmem:[%s710_s7 + $0x18] sm:$0xff]  ;;  %v483_v29 = vld [vmem:[%s710_s7 + $0x10] sm:$0xff]  ;;  %v495_v30 = vld [vmem:[%s707_s4] ss:$0 sm:$0xff] }
  0x14   :  { %166 = vmatpush.bf16.msra.mxu1 %v470_v4  ;;  %248 = vmatpush.bf16.msra.mxu2 %v479_v11  ;;  %v482_v36 = vld [vmem:[%s710_s7 + $0x8] sm:$0xff]  ;;  %v481_v37 = vld [vmem:[%s710_s7] sm:$0xff]  ;;  %s352_s7 = sshll.u32 %s712_s9, 4  ;;  %s353_s7 = int_to_ptr.hbm [resolvable:$true] %s352_s7 }
  0x15   :  { %v496_v38 = vld [vmem:[%s709_s6] ss:$0 sm:$0xff] }
  0x16   :  { %331 = vmatpush.bf16.msra.mxu3 %v487_v25  ;;  %v497_v44 = vld [vmem:[%s711_s8] ss:$0 sm:$0xff] }
  0x18   :  { %167 = vmatpush.bf16.msra.mxu1 %v469_v5  ;;  %249 = vmatpush.bf16.msra.mxu2 %v478_v12 }
  0x1a   :  { %332 = vmatpush.bf16.msra.mxu3 %v486_v26 }
  0x1c   :  { %168 = vmatpush.bf16.msra.mxu1 %v468_v6  ;;  %250 = vmatpush.bf16.msra.mxu2 %v477_v13 }
  0x1e   :  { %333 = vmatpush.bf16.msra.mxu3 %v485_v27 }
  0x20   :  { %169 = vmatpush.bf16.msra.mxu1 %v467_v7  ;;  %251 = vmatpush.bf16.msra.mxu2 %v476_v14 }
  0x22   :  { %334 = vmatpush.bf16.msra.mxu3 %v484_v28 }
  0x24   :  { %170 = vmatpush.bf16.msra.mxu1 %v466_v8  ;;  %252 = vmatpush.bf16.msra.mxu2 %v475_v15 }
  0x26   :  { %335 = vmatpush.bf16.msra.mxu3 %v483_v29 }
  0x28   :  { %171 = vmatpush.bf16.msra.mxu1 %v465_v9  ;;  %253 = vmatpush.bf16.msra.mxu2 %v474_v22 }
  0x2a   :  { %336 = vmatpush.bf16.msra.mxu3 %v482_v36 }
  0x2c   :  { %254 = vmatpush.bf16.msra.mxu2 %v473_v23 }
  0x2e   :  { %337 = vmatpush.bf16.msra.mxu3 %v481_v37 }
  0x8c   :  { %v90_v17 = vpop.f32.mrf.mxu0 }
  0x8d   :  { %v91_v18 = vadd.f32 %v494_v16, %v90_v17 }
  0x8f   :  { %v94_v19 = vmax.f32 %v91_v18, 0.0 }
  0x91   :  { %v95_v20 = vpack.c.bf16 %v94_v19, %v94_v19 }
  0x93   :  { %172 = vmatmul.bf16.vlgmr.msra.gmra.mxu1 %v95_v20 }
  0x94   :  { %v92_v21 = vpop.f32.mrf.mxu0 }
 0x110   :  { %v173_v31 = vpop.f32.mrf.mxu1 }
 0x111   :  { %v174_v32 = vadd.f32 %v495_v30, %v173_v31 }
 0x113   :  { %v177_v33 = vmax.f32 %v174_v32, 0.0 }
 0x115   :  { %v178_v34 = vpack.c.bf16 %v177_v33, %v177_v33 }
 0x117   :  { %255 = vmatmul.bf16.vlgmr.msra.gmra.mxu2 %v178_v34 }
 0x118   :  { %v175_v35 = vpop.f32.mrf.mxu1 }
 0x19a   :  { %v256_v39 = vpop.f32.mrf.mxu2 }
 0x19b   :  { %v257_v40 = vadd.f32 %v496_v38, %v256_v39 }
 0x19d   :  { %v260_v41 = vmax.f32 %v257_v40, 0.0 }
 0x19f   :  { %v261_v42 = vpack.c.bf16 %v260_v41, %v260_v41 }
 0x1a1   :  { %338 = vmatmul.bf16.vlgmr.msra.gmra.mxu3 %v261_v42 }
 0x1a2   :  { %v258_v43 = vpop.f32.mrf.mxu2 }
 0x224   :  { %v339_v45 = vpop.f32.mrf.mxu3 }
 0x225   :  { %v340_v46 = vadd.f32 %v497_v44, %v339_v45 }
 0x227   :  { %344 = vst.msk [vmem:[#allocation7] sm:$0xff] %vm343_vm1, %v340_v46 }
 0x228   :  { %355 = dma.vmem_to_hbm [thread:$0]  %s351_s13, 128, %s353_s7, [#allocation4]  }
 0x22c   :  { %v341_v47 = vpop.f32.mrf.mxu3 }
 0x22d   :  { %574 = dma.done.wait [#allocation4], 128  }
 0x22e   :  { %575 = vsyncadd [#allocation4], 4294967168 }
 0x22f   :  { %360 = vsyncpa [#allocation3], 1 }
 0x230   :  { %361 = vsyncpa [#allocation6], 1 }
 0x231   :  { %362 = vsyncpa [#allocation4], 1 }

</bundles_post_ra>
